<compile_context>
chip_gen: v5e
topology: v5e:2x2
jax: 0.10.0
libtpu: 0.0.40
codegen_flags: <defaults>
</compile_context>

<pallas_src>
import functools

import jax
import jax.numpy as jnp
from jax.experimental import pallas as pl
from jax.experimental.pallas import tpu as pltpu


_LANE = 128      # vreg lane width
_SUBLANE = 16    # bf16-friendly sublane multiple (also valid for f32)


def _round_up(n, m):
    return ((n + m - 1) // m) * m


def alphazero_kernel(x_ref, w1_ref, b1_ref, wh_ref, bh_ref, out_ref, *,
                     value_col):
    """One batch tile: hidden layer + fused (policy | value) head.

    x_ref  : [TILE_B, K]        input features (compute dtype, e.g. bf16)
    w1_ref : [K, H_pad]         fc1 weight, [in, out] layout (compute dtype)
    b1_ref : [1, H_pad]         fc1 bias (f32)
    wh_ref : [H_pad, F_pad]     fused [Wp | Wv] head weight (compute dtype)
    bh_ref : [1, F_pad]         fused [bp | bv] head bias (f32)
    out_ref: [TILE_B, F_pad]    output slab (f32): policy logits + value col
    """
    # Hidden layer: bf16 MXU matmul with f32 accumulation; bias + relu on VPU.
    h = jnp.dot(x_ref[...], w1_ref[...], preferred_element_type=jnp.float32)
    h = jnp.maximum(h + b1_ref[...], 0.0)

    # Fused heads: one MXU matmul producing policy logits and value together.
    f = jnp.dot(h.astype(wh_ref.dtype), wh_ref[...],
                preferred_element_type=jnp.float32)
    f = f + bh_ref[...]

    # tanh only on the 128-lane block containing the value column (always the
    # last block since value_col == max_actions); policy lane blocks are
    # stored untouched.  value_col / vb are static Python ints.
    vb = (value_col // _LANE) * _LANE
    if vb > 0:
        out_ref[:, :vb] = f[:, :vb].astype(out_ref.dtype)
    fv = f[:, vb:]
    col = jax.lax.broadcasted_iota(jnp.int32, fv.shape, 1)
    out_ref[:, vb:] = jnp.where(col == (value_col - vb), jnp.tanh(fv),
                                fv).astype(out_ref.dtype)


def prepare_params(w1, b1, wp, bp, wv, bv, *, param_dtype=jnp.bfloat16):
    """One-time parameter preprocessing (call OUTSIDE the inference loop).

    Fuses the policy/value heads into a single [hidden, max_actions+1]
    matmul, zero-pads output dims to 128-lane multiples and casts matmul
    weights to the compute dtype.  Weights are [in, out]; biases [1, out]
    (i.e. PyTorch `weight.T` / `bias[None, :]`).

    Returns ((w1_p, b1_p, wh_p, bh_p), max_actions).
    """
    input_size, hidden = w1.shape
    max_actions = wp.shape[1]
    fused_out = max_actions + 1

    H_pad = _round_up(hidden, _LANE)
    F_pad = _round_up(fused_out, _LANE)

    wh = jnp.concatenate([wp, wv], axis=1)   # [hidden, max_actions+1]
    bh = jnp.concatenate([bp, bv], axis=1)   # [1, max_actions+1]

    # NOTE: x's contraction dim (input_size) is NOT padded -- the BlockSpec
    # uses the full array dim there; the MXU handles the short contraction.
    w1_p = jnp.pad(w1, ((0, 0), (0, H_pad - hidden))).astype(param_dtype)
    b1_p = jnp.pad(b1, ((0, 0), (0, H_pad - hidden))).astype(jnp.float32)
    wh_p = jnp.pad(
        wh, ((0, H_pad - hidden), (0, F_pad - fused_out))).astype(param_dtype)
    bh_p = jnp.pad(bh, ((0, 0), (0, F_pad - fused_out))).astype(jnp.float32)

    return (w1_p, b1_p, wh_p, bh_p), max_actions


def alphazero_forward(x, padded_params, max_actions, *, tile_b=512):
    """x: [B, input_size]; padded_params from prepare_params().

    Returns (policy_logits [B, max_actions] f32, value [B, 1] f32).
    """
    w1_p, b1_p, wh_p, bh_p = padded_params
    B, input_size = x.shape
    assert w1_p.shape[0] == input_size
    K = input_size
    H_pad = w1_p.shape[1]
    F_pad = wh_p.shape[1]

    # Cast activations to the weights' compute dtype (no-op if caller already
    # feeds bf16): halves the dominant x DMA on this memory/latency-bound net.
    x = x.astype(w1_p.dtype)

    # ---- batch tiling ------------------------------------------------------
    # Adaptive TILE_B: at most `tile_b` rows, at least 2 grid steps when B is
    # big enough (so both v7x TensorCores get work under "parallel"
    # semantics), rounded to a 16-row sublane multiple and sized to keep
    # zero-row padding waste minimal.
    num_tiles = pl.cdiv(B, tile_b)
    if num_tiles == 1 and B >= 2 * _SUBLANE:
        num_tiles = 2
    TILE_B = _round_up(pl.cdiv(B, num_tiles), _SUBLANE)
    B_pad = num_tiles * TILE_B
    x_p = jnp.pad(x, ((0, B_pad - B), (0, 0))) if B_pad != B else x

    kernel = functools.partial(alphazero_kernel, value_col=max_actions)

    itemsize = jnp.dtype(w1_p.dtype).itemsize
    cost = pl.CostEstimate(
        flops=2 * B_pad * (K * H_pad + H_pad * F_pad),
        transcendentals=B_pad * _LANE,   # tanh over one lane block per row
        bytes_accessed=(itemsize * (B_pad * K + K * H_pad + H_pad * F_pad)
                        + 4 * (H_pad + F_pad + B_pad * F_pad)),
    )

    out = pl.pallas_call(
        kernel,
        out_shape=jax.ShapeDtypeStruct((B_pad, F_pad), jnp.float32),
        grid=(num_tiles,),
        in_specs=[
            pl.BlockSpec((TILE_B, K), lambda i: (i, 0)),     # x: batch-tiled
            pl.BlockSpec((K, H_pad), lambda i: (0, 0)),      # W1: resident
            pl.BlockSpec((1, H_pad), lambda i: (0, 0)),      # b1: resident
            pl.BlockSpec((H_pad, F_pad), lambda i: (0, 0)),  # W_head: resident
            pl.BlockSpec((1, F_pad), lambda i: (0, 0)),      # b_head: resident
        ],
        out_specs=pl.BlockSpec((TILE_B, F_pad), lambda i: (i, 0)),
        compiler_params=pltpu.CompilerParams(
            dimension_semantics=("parallel",),
            # Headroom over the default scoped limit (16 MiB v5e / 32 MiB
            # v6e+v7x) so realistic action spaces with double-buffered
            # resident weights still fit; below v7x's 64 MiB physical VMEM.
            vmem_limit_bytes=48 * 1024 * 1024,
        ),
        cost_estimate=cost,
    )(x_p, w1_p, b1_p, wh_p, bh_p)

    policy_logits = out[:B, :max_actions]
    value = out[:B, max_actions:max_actions + 1]
    return policy_logits, value


def init_params(key, input_size, hidden_size, max_actions):
    """Deterministic PyTorch-style init: U(-1/sqrt(fan_in), 1/sqrt(fan_in))."""
    ks = jax.random.split(key, 6)

    def lin(kw, kb, fan_in, fan_out):
        bound = 1.0 / jnp.sqrt(jnp.float32(fan_in))
        w = jax.random.uniform(kw, (fan_in, fan_out), jnp.float32, -bound, bound)
        b = jax.random.uniform(kb, (1, fan_out), jnp.float32, -bound, bound)
        return w, b

    w1, b1 = lin(ks[0], ks[1], input_size, hidden_size)
    wp, bp = lin(ks[2], ks[3], hidden_size, max_actions)
    wv, bv = lin(ks[4], ks[5], hidden_size, 1)
    return w1, b1, wp, bp, wv, bv


if __name__ == "__main__":
    # Small shapes consistent with the module's forward: flat feature input.
    batch = 32
    input_size = 32
    hidden_size = 64
    max_actions = 16

    key = jax.random.PRNGKey(0)
    k_x, k_p = jax.random.split(key)

    x = jax.random.normal(k_x, (batch, input_size), jnp.float32)
    raw_params = init_params(k_p, input_size, hidden_size, max_actions)

    # One-time parameter preprocessing (outside the hot inference loop).
    padded_params, ma = prepare_params(*raw_params, param_dtype=jnp.bfloat16)

    fwd = jax.jit(functools.partial(alphazero_forward, max_actions=ma,
                                    tile_b=512))
    policy_logits, value = fwd(x, padded_params)
    jax.block_until_ready((policy_logits, value))

    # Pure-JAX f32 reference of the same forward pass.
    w1, b1, wp, bp, wv, bv = raw_params
    h_ref = jnp.maximum(x @ w1 + b1, 0.0)
    policy_ref = h_ref @ wp + bp
    value_ref = jnp.tanh(h_ref @ wv + bv)

    assert policy_logits.shape == (batch, max_actions)
    assert value.shape == (batch, 1)
    # bf16 matmul operands (f32 accumulation) vs f32 reference -> loose tol.
    assert jnp.allclose(policy_logits, policy_ref, atol=3e-2, rtol=3e-2)
    assert jnp.allclose(value, value_ref, atol=3e-2, rtol=3e-2)

    print("KERNEL_OK")
</pallas_src>

<mosaic_0001>
module attributes {stable_mosaic.version = 11 : i64} {
  func.func @alphazero_kernel(%arg0: i32, %arg1: memref<16x32xbf16, #tpu.memory_space<vmem>>, %arg2: memref<32x128xbf16, #tpu.memory_space<vmem>>, %arg3: memref<1x128xf32, #tpu.memory_space<vmem>>, %arg4: memref<128x128xbf16, #tpu.memory_space<vmem>>, %arg5: memref<1x128xf32, #tpu.memory_space<vmem>>, %arg6: memref<16x128xf32, #tpu.memory_space<vmem>>) attributes {dimension_semantics = [#tpu.dimension_semantics<parallel>], iteration_bounds = array<i64: 2>, scalar_prefetch = 0 : i64, scratch_operands = 0 : i64, tpu.core_type = #tpu.core_type<tc>, window_params = [{transform_indices = @transform_0, window_bounds = array<i64: 16, 32>}, {pipeline_mode = #tpu.pipeline_mode<synchronous>, transform_indices = @transform_1, window_bounds = array<i64: 32, 128>}, {pipeline_mode = #tpu.pipeline_mode<synchronous>, transform_indices = @transform_2, window_bounds = array<i64: 1, 128>}, {pipeline_mode = #tpu.pipeline_mode<synchronous>, transform_indices = @transform_3, window_bounds = array<i64: 128, 128>}, {pipeline_mode = #tpu.pipeline_mode<synchronous>, transform_indices = @transform_4, window_bounds = array<i64: 1, 128>}, {transform_indices = @transform_5, window_bounds = array<i64: 16, 128>}]} {
    %c0 = arith.constant 0 : index
    %c0_0 = arith.constant 0 : index
    %0 = vector.load %arg1[%c0, %c0_0] : memref<16x32xbf16, #tpu.memory_space<vmem>>, vector<16x32xbf16>
    %c0_1 = arith.constant 0 : index
    %c0_2 = arith.constant 0 : index
    %1 = vector.load %arg2[%c0_1, %c0_2] : memref<32x128xbf16, #tpu.memory_space<vmem>>, vector<32x128xbf16>
    %cst = arith.constant dense<0.000000e+00> : vector<16x128xf32>
    %2 = tpu.matmul %0, %1, %cst {dimension_numbers = #tpu.dot_dimension_numbers<[1], [0], [0], [1], [0, 0, 1, 1], [], []>} : vector<16x32xbf16>, vector<32x128xbf16>, vector<16x128xf32> -> vector<16x128xf32>
    %c0_3 = arith.constant 0 : index
    %c0_4 = arith.constant 0 : index
    %3 = vector.load %arg3[%c0_3, %c0_4] : memref<1x128xf32, #tpu.memory_space<vmem>>, vector<1x128xf32>
    %4 = vector.broadcast %3 : vector<1x128xf32> to vector<16x128xf32>
    %5 = arith.addf %2, %4 : vector<16x128xf32>
    %cst_5 = arith.constant 0.000000e+00 : f32
    %6 = vector.broadcast %cst_5 : f32 to vector<16x128xf32>
    %7 = arith.maximumf %5, %6 : vector<16x128xf32>
    %8 = arith.truncf %7 : vector<16x128xf32> to vector<16x128xbf16>
    %c0_6 = arith.constant 0 : index
    %c0_7 = arith.constant 0 : index
    %9 = vector.load %arg4[%c0_6, %c0_7] : memref<128x128xbf16, #tpu.memory_space<vmem>>, vector<128x128xbf16>
    %cst_8 = arith.constant dense<0.000000e+00> : vector<16x128xf32>
    %10 = tpu.matmul %8, %9, %cst_8 {dimension_numbers = #tpu.dot_dimension_numbers<[1], [0], [0], [1], [0, 0, 1, 1], [], []>} : vector<16x128xbf16>, vector<128x128xbf16>, vector<16x128xf32> -> vector<16x128xf32>
    %c0_9 = arith.constant 0 : index
    %c0_10 = arith.constant 0 : index
    %11 = vector.load %arg5[%c0_9, %c0_10] : memref<1x128xf32, #tpu.memory_space<vmem>>, vector<1x128xf32>
    %12 = vector.broadcast %11 : vector<1x128xf32> to vector<16x128xf32>
    %13 = arith.addf %10, %12 : vector<16x128xf32>
    %14 = tpu.iota {dimensions = array<i32: 1>} : vector<16x128xi32>
    %c16_i32 = arith.constant 16 : i32
    %15 = vector.broadcast %c16_i32 : i32 to vector<16x128xi32>
    %16 = arith.cmpi eq, %14, %15 : vector<16x128xi32>
    %17 = math.tanh %13 : vector<16x128xf32>
    %18 = arith.select %16, %17, %13 : vector<16x128xi1>, vector<16x128xf32>
    %c0_11 = arith.constant 0 : index
    %c0_12 = arith.constant 0 : index
    %19 = vector.load %arg6[%c0_11, %c0_12] : memref<16x128xf32, #tpu.memory_space<vmem>>, vector<16x128xf32>
    tpu.vector_store %arg6[%c0_11, %c0_12], %18 {strides = array<i32>} : memref<16x128xf32, #tpu.memory_space<vmem>>, vector<16x128xf32>,
    return
  }
  func.func @transform_0(%arg0: i32) -> (i32, i32) {
    %c0_i32 = arith.constant 0 : i32
    %c0_i32_0 = arith.constant 0 : i32
    return %arg0, %c0_i32 : i32, i32
  }
  func.func @transform_1(%arg0: i32) -> (i32, i32) {
    %c0_i32 = arith.constant 0 : i32
    %c0_i32_0 = arith.constant 0 : i32
    %c0_i32_1 = arith.constant 0 : i32
    return %c0_i32, %c0_i32_0 : i32, i32
  }
  func.func @transform_2(%arg0: i32) -> (i32, i32) {
    %c0_i32 = arith.constant 0 : i32
    %c0_i32_0 = arith.constant 0 : i32
    %c0_i32_1 = arith.constant 0 : i32
    return %c0_i32, %c0_i32_0 : i32, i32
  }
  func.func @transform_3(%arg0: i32) -> (i32, i32) {
    %c0_i32 = arith.constant 0 : i32
    %c0_i32_0 = arith.constant 0 : i32
    %c0_i32_1 = arith.constant 0 : i32
    return %c0_i32, %c0_i32_0 : i32, i32
  }
  func.func @transform_4(%arg0: i32) -> (i32, i32) {
    %c0_i32 = arith.constant 0 : i32
    %c0_i32_0 = arith.constant 0 : i32
    %c0_i32_1 = arith.constant 0 : i32
    return %c0_i32, %c0_i32_0 : i32, i32
  }
  func.func @transform_5(%arg0: i32) -> (i32, i32) {
    %c0_i32 = arith.constant 0 : i32
    %c0_i32_0 = arith.constant 0 : i32
    return %arg0, %c0_i32 : i32, i32
  }
}

</mosaic_0001>

<bundles_post_ra>
// kernel: alphazero_forward.1
= control target key start
LH: loop header
LB: loop body
LE: loop exit
PB: predicated region body
PF: predicated region fallthrough
CT: control target
= control target key end

     0   :  { %10 = vsyncpa [#allocation3], 0  ;;  %s624_s18 = smov 0   ;;  %s660_s0 = inlined_call_operand.vmem [shape: bf16[32,32], index: 0, kind: input, shape index: {}]   ;;  %s661_s1 = inlined_call_operand.vmem [shape: bf16[32,128], index: 1, kind: input, shape index: {}]   ;;  %s662_s2 = inlined_call_operand.vmem [shape: f32[1,128], index: 2, kind: input, shape index: {}]   ;;  %s663_s3 = inlined_call_operand.hbm [shape: bf16[128,128], index: 3, kind: input, shape index: {}]   ;;  %s664_s4 = inlined_call_operand.vmem [shape: f32[1,128], index: 4, kind: input, shape index: {}]   ;;  %s665_s5 = inlined_call_operand.vmem [shape: f32[32,128], index: 5, kind: output, shape index: {}]  }
   0x1 LB: > { %s174_s21 = sshll.u32 %s663_s3, 4  ;;  %s453_s22 = sadd.s32 4294967295, %s589_s18   ;;  %s589_s18 = sphi %s624_s18, %s16_s18   ;;  %s175_s21 = int_to_ptr.hbm [resolvable:$true] %s174_s21 }
   0x2   : > { %p455_p0 = scmp.ge.s32.totalorder %s589_s18, 1  ;;  %p157_p1 = scmp.lt.s32.totalorder %s589_s18, 3 }
   0x3   : > { %p530_p2 = scmp.eq.s32.totalorder %s453_s22, 0  ;;  %s591_s23 = smov [#allocation2]  }
   0x4   : > { %p158_p3 = pnand %p455_p0, %p157_p1  ;;  %s176_s24 = sshll.u32 %s591_s23, 4  ;;  %s177_s24 = int_to_ptr.vmem [resolvable:$true] %s176_s24 }
   0x5   : > { %s592_s25 = smov 64   ;;  %s593_s26 = smov 4  }
   0x6   : > { %p526_p4 = pneg %p158_p3  ;;  %204 = sbr.rel (%p158_p3) target bundleno = 305 (0x131), region = 40 }
   0x8   : > { %p527_p5 = pnand %p530_p2, %p526_p4 }
   0xa   : > { %529 = dma.hbm_to_vmem [thread:$0]  (!%p527_p5), %s175_s21, 1024, %s177_s24, [#allocation3], %s592_s25, %s592_s25, %s593_s26  }
   0xb   : > { %584 = dma.done.wait (%p530_p2), [#allocation3], 1024  }
   0xc   : > { %586 = vsyncadd (%p530_p2), [#allocation3], 4294966272  ;;  %s460_s27 = sshll.u32 %s453_s22, 1  ;;  %v513_v0 = vld [vmem:[%s661_s1 + $0x8] sm:$0xff]  ;;  %v521_v1 = vld [vmem:[#allocation2 + $0x38] sm:$0xff]  ;;  %vm273_vm0 = vcmask 261120   ;;  %v376_v20 = vlaneseq }
   0xd   : > { %p234_p6 = scmp.lt.s32.totalorder %s460_s27, 3  ;;  %283 = vmatpush.bf16.msra.mxu0 %v513_v0  ;;  %v512_v2 = vld [vmem:[%s661_s1] sm:$0xff]  ;;  %362 = vmatpush.bf16.msra.mxu1 %v521_v1  ;;  %v520_v3 = vld [vmem:[#allocation2 + $0x30] sm:$0xff]  ;;  %v519_v5 = vld [vmem:[#allocation2 + $0x28] sm:$0xff] }
   0xe   : > { %v518_v6 = vld [vmem:[#allocation2 + $0x20] sm:$0xff]  ;;  %v517_v7 = vld [vmem:[#allocation2 + $0x18] sm:$0xff]  ;;  %v516_v8 = vld [vmem:[#allocation2 + $0x10] sm:$0xff]  ;;  %v377_v23 = vand.u32 127, %v376_v20 }
   0xf   : > { %s667_s27 = smov (!%p234_p6, %s460_s27), 3  ;;  %v515_v9 = vld [vmem:[#allocation2 + $0x8] sm:$0xff]  ;;  %v514_v10 = vld [vmem:[#allocation2] sm:$0xff] }
  0x10   : > { %s461_s28 = sshll.u32 %s667_s27, 2  ;;  %v543_v12 = vld [vmem:[%s662_s2] ss:$0 sm:$0xff]  ;;  %s463_s15 = sshll.u32 %s667_s27, 3  ;;  %vm378_vm1 = vcmp.eq.s32.totalorder %v377_v23, 16 }
  0x11   : > { %s237_s10 = scalar_lea.vmem %s660_s0, %s461_s28  ;;  %284 = vmatpush.bf16.msra.mxu0 %v512_v2  ;;  %363 = vmatpush.bf16.msra.mxu1 %v520_v3  ;;  %v544_v19 = vld [vmem:[%s664_s4] ss:$0 sm:$0xff]  ;;  %s243_s19 = scalar_lea.vmem %s665_s5, %s463_s15 }
  0x12   : > { %v511_v4 = vld [vmem:[%s237_s10] sm:$0xff] }
  0x14   : > { %476 = vmatmul.msk.bf16.vlgmr.msra.gmra.mxu0 %vm273_vm0, %v511_v4 }
  0x15   : > { %364 = vmatpush.bf16.msra.mxu1 %v519_v5 }
  0x19   : > { %365 = vmatpush.bf16.msra.mxu1 %v518_v6 }
  0x1d   : > { %366 = vmatpush.bf16.msra.mxu1 %v517_v7 }
  0x21   : > { %367 = vmatpush.bf16.msra.mxu1 %v516_v8 }
  0x25   : > { %368 = vmatpush.bf16.msra.mxu1 %v515_v9 }
  0x29   : > { %369 = vmatpush.bf16.msra.mxu1 %v514_v10 }
  0x91   : > { %v286_v11 = vpop.f32.mrf.mxu0 }
  0x92   : > { %v287_v13 = vadd.f32 %v543_v12, %v286_v11 }
  0x94   : > { %v291_v16 = vmax.f32 %v287_v13, 0.0 }
  0x99   : > { %v288_v14 = vpop.f32.mrf.mxu0 }
  0x9a   : > { %v289_v15 = vadd.f32 %v543_v12, %v288_v14 }
  0x9c   : > { %v292_v17 = vmax.f32 %v289_v15, 0.0 }
  0x9e   : > { %v293_v18 = vpack.c.bf16 %v292_v17, %v291_v16 }
  0xa0   : > { %370 = vmatmul.bf16.vlgmr.msra.gmra.mxu1 %v293_v18 }
 0x11d   : > { %v371_v21 = vpop.f32.mrf.mxu1 }
 0x11e   : > { %v372_v22 = vadd.f32 %v544_v19, %v371_v21 }
 0x120   : > { %545 = vtanh.f32 %v372_v22 }
 0x125   : > { %v373_v24 = vpop.f32.mrf.mxu1 }
 0x126   : > { %v546_v25 = vpop.eup %545  ;;  %v374_v26 = vadd.f32 %v544_v19, %v373_v24 }
 0x127   : > { %v381_v27 = vsel %vm378_vm1, %v546_v25, %v372_v22 }
 0x128   : > { %383 = vst [vmem:[%s243_s19] sm:$0xff] %v381_v27  ;;  %547 = vtanh.f32 %v374_v26 }
 0x12e   : > { %v548_v28 = vpop.eup %547 }
 0x12f   : > { %v382_v29 = vsel %vm378_vm1, %v548_v28, %v374_v26 }
 0x130   : > { %384 = vst [vmem:[%s243_s19 + $0x8] sm:$0xff] %v382_v29 }
 0x131 PF: > { %s16_s18 = sadd.s32 1, %s589_s18  }
 0x132   : > { %p13_p7 = scmp.ge.s32.totalorder %s16_s18, 4  }
 0x134   :  { %15 = sbr.rel (!%p13_p7) target bundleno = 1 (0x1), region = 75 }
 0x139   :  { %407 = vsyncpa [#allocation3], 1 }
 0x13a   :  { %409 = vsyncpa [#allocation3 + $0x1], 1 }

</bundles_post_ra>
